<compile_context>
chip_gen: v6e
topology: v6e:2x2x1
jax: 0.10.0
libtpu: 0.0.40
codegen_flags: <defaults>
</compile_context>

<pallas_src>
import functools

import jax
import jax.numpy as jnp
import numpy as np
from jax.experimental import pallas as pl
from jax.experimental.pallas import tpu as pltpu

_VMEM_LIMIT = 48 * 1024 * 1024   # safe on v5e/v6e (128 MiB phys) and v7x (64 MiB phys)


def _largest_divisor_leq(n, cap):
    for c in range(min(n, cap), 0, -1):
        if n % c == 0:
            return c
    return 1


# ---------------------------------------------------------------------------
# Kernel 1: router path (memory-bound, VPU/EUP).  grid = (batch, vocab tiles)
#   full_router = log(1 + relu(logits)) * mask ; router_max = max over seq
# ---------------------------------------------------------------------------
def _router_kernel(logits_ref, mask_ref, full_ref, max_ref):
    mask = mask_ref[0]                                            # [Lm, 1]
    # TODO(synk): jnp.log1p would save one VPU add but jnp.log(1+x) is kept as
    # the guaranteed-lowering form; argument is >= 1 so accuracy is identical.
    full = jnp.log(1.0 + jnp.maximum(logits_ref[0], 0.0)) * mask  # [Lm, TV]
    full_ref[0] = full
    max_ref[0] = jnp.max(full, axis=0, keepdims=True)             # [1, TV]


# ---------------------------------------------------------------------------
# Kernel 2: expert projection (MXU).  batch*seq folded into M.
#   expert = (hs @ W_tok + b_tok) * mask
# ---------------------------------------------------------------------------
def _expert_kernel(hs_ref, mask_ref, w_ref, b_ref, out_ref):
    out_ref[...] = (jnp.dot(hs_ref[...], w_ref[...],
                            preferred_element_type=jnp.float32)
                    + b_ref[...]) * mask_ref[...]


# ---------------------------------------------------------------------------
# Kernel 3: cls projection, one batched matmul for the whole batch.
# ---------------------------------------------------------------------------
def _cls_kernel(x_ref, w_ref, b_ref, out_ref):
    out_ref[...] = jnp.dot(x_ref[...], w_ref[...],
                           preferred_element_type=jnp.float32) + b_ref[...]


def citadel_embed(hidden_states, logits, attention_mask, params, topk):
    """CITADEL.embed (eval mode, citadel_score_type='full', args.no_sep=True)."""
    B, L, H = hidden_states.shape
    V = logits.shape[-1]
    TOK = params['W_tok'].shape[1]
    CLS = params['W_cls'].shape[1]
    Lm = L - 1

    # glue: mask_sep (zero out [SEP]) then drop the [CLS] position.
    sep_pos = jnp.sum(attention_mask, axis=1).astype(jnp.int32) - 1
    pos = jnp.arange(L, dtype=jnp.int32)[None, :]
    mask = attention_mask * (pos != sep_pos[:, None]).astype(attention_mask.dtype)
    mask = mask[:, 1:].astype(jnp.float32)                        # [B, Lm]

    hs = hidden_states[:, 1:, :]                                  # [B, Lm, H]
    lg = logits[:, 1:, :]                                         # [B, Lm, V]
    cls_hs = hidden_states[:, 0, :]                               # [B, H]

    # --- router path: 2-D grid (batch, vocab tile), vocab tiled at 2048 lanes ---
    TV = V if V <= 2048 else 2048                                 # multiple of 128 when < V
    nv = pl.cdiv(V, TV)
    full_router, router_max = pl.pallas_call(
        _router_kernel,
        out_shape=(jax.ShapeDtypeStruct((B, Lm, V), jnp.float32),
                   jax.ShapeDtypeStruct((B, 1, V), jnp.float32)),
        grid_spec=pltpu.PrefetchScalarGridSpec(
            num_scalar_prefetch=0,
            grid=(B, nv),
            in_specs=[
                pl.BlockSpec((1, Lm, TV), lambda b, v: (b, 0, v)),
                pl.BlockSpec((1, Lm, 1), lambda b, v: (b, 0, 0)),
            ],
            out_specs=[
                pl.BlockSpec((1, Lm, TV), lambda b, v: (b, 0, v)),
                pl.BlockSpec((1, 1, TV), lambda b, v: (b, 0, v)),
            ],
        ),
        compiler_params=pltpu.CompilerParams(
            dimension_semantics=("parallel", "parallel"),
            vmem_limit_bytes=_VMEM_LIMIT),
    )(lg, mask[:, :, None])

    # --- expert projection: fold batch*seq into M (fills MXU sublanes) ---------
    M = B * Lm
    TM = M if M <= 512 else 512
    hs_flat = hs.reshape(M, H)
    mask_flat = mask.reshape(M, 1)
    expert_flat = pl.pallas_call(
        _expert_kernel,
        out_shape=jax.ShapeDtypeStruct((M, TOK), jnp.float32),
        grid_spec=pltpu.PrefetchScalarGridSpec(
            num_scalar_prefetch=0,
            grid=(pl.cdiv(M, TM),),
            in_specs=[
                pl.BlockSpec((TM, H), lambda i: (i, 0)),
                pl.BlockSpec((TM, 1), lambda i: (i, 0)),
                pl.BlockSpec((H, TOK), lambda i: (0, 0)),
                pl.BlockSpec((1, TOK), lambda i: (0, 0)),
            ],
            out_specs=pl.BlockSpec((TM, TOK), lambda i: (i, 0)),
        ),
        compiler_params=pltpu.CompilerParams(
            dimension_semantics=("parallel",),
            vmem_limit_bytes=_VMEM_LIMIT),
    )(hs_flat, mask_flat, params['W_tok'], params['b_tok'][None, :])
    expert = expert_flat.reshape(B, Lm, TOK)

    # --- cls projection: one (B,H)@(H,CLS) matmul for the whole batch ----------
    cls_repr = pl.pallas_call(
        _cls_kernel,
        out_shape=jax.ShapeDtypeStruct((B, CLS), jnp.float32),
        grid_spec=pltpu.PrefetchScalarGridSpec(
            num_scalar_prefetch=0,
            grid=(1,),
            in_specs=[
                pl.BlockSpec((B, H), lambda i: (0, 0)),
                pl.BlockSpec((H, CLS), lambda i: (0, 0)),
                pl.BlockSpec((1, CLS), lambda i: (0, 0)),
            ],
            out_specs=pl.BlockSpec((B, CLS), lambda i: (0, 0)),
        ),
        compiler_params=pltpu.CompilerParams(
            dimension_semantics=("arbitrary",),
            vmem_limit_bytes=_VMEM_LIMIT),
    )(cls_hs, params['W_cls'], params['b_cls'][None, :])

    # TODO(synk): torch.topk has no clean Pallas TPU equivalent; done with
    # jax.lax.top_k in plain JAX (glue). Training-only router_mask scatter and
    # router_softmax_repr are also omitted (eval path).
    expert_weights, expert_ids = jax.lax.top_k(full_router, topk)

    return {
        'expert_repr': expert,
        'expert_weights': expert_weights,
        'expert_ids': expert_ids.astype(jnp.int32),
        'router_repr': router_max[:, 0, :],
        'cls_repr': cls_repr,
    }


# ---------------------------------------------------------------------------
# Kernel 4: CITADEL.evaluate_score == score_cart (citadel_score_type='full')
#   grid = (query tiles, doc tiles); queries are batched into the MXU M dim,
#   docs are streamed per tile; expert-match gating is vectorized across the
#   whole doc tile (only tiny Eq/Ed/TND loops remain).
# ---------------------------------------------------------------------------
def _score_cart_kernel(q_ref, qw_ref, qid_ref, qcls_ref,
                       d_ref, dw_ref, did_ref, dcls_ref,
                       out_ref, *, BQ, Lq, TND, Ld, Eq, Ed):
    q = q_ref[0]                              # [M, D], M = BQ*Lq
    qw = qw_ref[0]                            # [M, Eq]
    qid = qid_ref[0]                          # [M, Eq] int32
    d = d_ref[0]                              # [T, D], T = TND*Ld
    dw = dw_ref[0]                            # [Ed, T]
    did = did_ref[0]                          # [Ed, T] int32
    M = BQ * Lq
    T = TND * Ld

    # scores_wo_weight_match: 'kd,td->kt' for all queries x all docs in this tile
    s = jax.lax.dot_general(q, d, (((1,), (1,)), ((), ())),
                            preferred_element_type=jnp.float32)    # [M, T]

    tok_acc = jnp.zeros((M, TND), jnp.float32)
    for e1 in range(Eq):                      # Eq is tiny (1 for queries)
        qw_col = qw[:, e1:e1 + 1]             # [M, 1]
        qid_col = qid[:, e1:e1 + 1]           # [M, 1]
        best = jnp.full((M, T), -jnp.inf, jnp.float32)
        for e2 in range(Ed):                  # Ed tiny (<= 5)
            dw_row = dw[e2:e2 + 1, :]         # [1, T]
            did_row = did[e2:e2 + 1, :]       # [1, T]
            match = (qid_col == did_row).astype(jnp.float32)       # [M, T]
            best = jnp.maximum(best, s * qw_col * dw_row * match)
        # max over (doc token, doc expert) within each doc of the tile
        doc_max = jnp.concatenate(
            [jnp.max(best[:, j * Ld:(j + 1) * Ld], axis=1, keepdims=True)
             for j in range(TND)], axis=1)    # [M, TND]
        tok_acc = tok_acc + doc_max

    # sum over (query token, query expert) per query
    tok = jnp.concatenate(
        [jnp.sum(tok_acc[b * Lq:(b + 1) * Lq, :], axis=0, keepdims=True)
         for b in range(BQ)], axis=0)         # [BQ, TND]

    cls = jax.lax.dot_general(qcls_ref[0], dcls_ref[0], (((1,), (1,)), ((), ())),
                              preferred_element_type=jnp.float32)  # [BQ, TND]
    out_ref[0, 0] = tok + cls


def citadel_score_cart(q_emb, d_emb, *, max_docs_per_tile=8, max_queries_per_tile=8):
    q_repr, q_w, q_ids = q_emb['expert_repr'], q_emb['expert_weights'], q_emb['expert_ids']
    d_repr, d_w, d_ids = d_emb['expert_repr'], d_emb['expert_weights'], d_emb['expert_ids']
    Nq, Lq, D = q_repr.shape
    Nd, Ld, Ed = d_w.shape
    Eq = q_w.shape[-1]
    C = q_emb['cls_repr'].shape[-1]

    BQ = _largest_divisor_leq(Nq, max_queries_per_tile)
    TND = _largest_divisor_leq(Nd, max_docs_per_tile)
    nq_t = Nq // BQ
    nd_t = Nd // TND

    # glue: fold the tile structure into a leading axis so every kernel block is
    # a full slab along its last two dims (always layout-legal) and doc tiles
    # stream through VMEM instead of being fully resident.
    q_flat = q_repr.reshape(nq_t, BQ * Lq, D)
    qw_flat = q_w.reshape(nq_t, BQ * Lq, Eq)
    qid_flat = q_ids.reshape(nq_t, BQ * Lq, Eq)
    q_cls = q_emb['cls_repr'].reshape(nq_t, BQ, C)

    d_flat = d_repr.reshape(nd_t, TND * Ld, D)
    dw_t = jnp.transpose(d_w.reshape(nd_t, TND, Ld, Ed),
                         (0, 3, 1, 2)).reshape(nd_t, Ed, TND * Ld)
    did_t = jnp.transpose(d_ids.reshape(nd_t, TND, Ld, Ed),
                          (0, 3, 1, 2)).reshape(nd_t, Ed, TND * Ld)
    d_cls = d_emb['cls_repr'].reshape(nd_t, TND, C)

    kernel = functools.partial(_score_cart_kernel,
                               BQ=BQ, Lq=Lq, TND=TND, Ld=Ld, Eq=Eq, Ed=Ed)
    out = pl.pallas_call(
        kernel,
        out_shape=jax.ShapeDtypeStruct((nq_t, nd_t, BQ, TND), jnp.float32),
        grid_spec=pltpu.PrefetchScalarGridSpec(
            num_scalar_prefetch=0,
            grid=(nq_t, nd_t),
            in_specs=[
                pl.BlockSpec((1, BQ * Lq, D), lambda i, j: (i, 0, 0)),
                pl.BlockSpec((1, BQ * Lq, Eq), lambda i, j: (i, 0, 0)),
                pl.BlockSpec((1, BQ * Lq, Eq), lambda i, j: (i, 0, 0)),
                pl.BlockSpec((1, BQ, C), lambda i, j: (i, 0, 0)),
                pl.BlockSpec((1, TND * Ld, D), lambda i, j: (j, 0, 0)),
                pl.BlockSpec((1, Ed, TND * Ld), lambda i, j: (j, 0, 0)),
                pl.BlockSpec((1, Ed, TND * Ld), lambda i, j: (j, 0, 0)),
                pl.BlockSpec((1, TND, C), lambda i, j: (j, 0, 0)),
            ],
            out_specs=pl.BlockSpec((1, 1, BQ, TND), lambda i, j: (i, j, 0, 0)),
        ),
        compiler_params=pltpu.CompilerParams(
            dimension_semantics=("parallel", "parallel"),
            vmem_limit_bytes=_VMEM_LIMIT),
    )(q_flat, qw_flat, qid_flat, q_cls, d_flat, dw_t, did_t, d_cls)

    return out.transpose(0, 2, 1, 3).reshape(Nq, Nd)      # [Nq, Nd]


# ---------------------------------------------------------------------------
# Plain-JAX references (for correctness checking only)
# ---------------------------------------------------------------------------
def embed_ref(hidden_states, logits, attention_mask, params, topk):
    B, L, H = hidden_states.shape
    sep_pos = jnp.sum(attention_mask, axis=1).astype(jnp.int32) - 1
    pos = jnp.arange(L, dtype=jnp.int32)[None, :]
    am = attention_mask * (pos != sep_pos[:, None]).astype(attention_mask.dtype)
    am = am[:, 1:].astype(jnp.float32)
    hs = hidden_states[:, 1:, :]
    lg = logits[:, 1:, :]
    full_router = jnp.log(1.0 + jax.nn.relu(lg)) * am[..., None]
    router_repr = jnp.max(full_router, axis=1)
    ew, ei = jax.lax.top_k(full_router, topk)
    expert_repr = (hs @ params['W_tok'] + params['b_tok']) * am[..., None]
    cls_repr = hidden_states[:, 0, :] @ params['W_cls'] + params['b_cls']
    return {'expert_repr': expert_repr, 'expert_weights': ew,
            'expert_ids': ei.astype(jnp.int32), 'router_repr': router_repr,
            'cls_repr': cls_repr}


def score_cart_ref(q_emb, d_emb):
    qr, qw, qi = q_emb['expert_repr'], q_emb['expert_weights'], q_emb['expert_ids']
    dr, dw, di = d_emb['expert_repr'], d_emb['expert_weights'], d_emb['expert_ids']
    s = jnp.einsum('ikd,jqd->ikjq', qr, dr)
    w = qw[:, :, :, None, None, None] * dw[None, None, None, :, :, :]
    em = (qi[:, :, :, None, None, None] == di[None, None, None, :, :, :]).astype(jnp.float32)
    sc = s[:, :, None, :, :, None] * w * em
    Nq, Lq, Eq, Nd, Ld, Ed = sc.shape
    sc = sc.reshape(Nq, Lq * Eq, Nd, Ld * Ed)
    tok = sc.max(-1).sum(1)
    cls = q_emb['cls_repr'] @ d_emb['cls_repr'].T
    return tok + cls


if __name__ == "__main__":
    key = jax.random.PRNGKey(0)
    ks = jax.random.split(key, 8)

    # small shapes: batch=2, seq=8 (incl. [CLS]/[SEP]), hidden=32, vocab=64
    B, L, H, V = 2, 8, 32, 64
    TOK_DIM, CLS_DIM = 16, 16

    params = {
        'W_tok': 0.02 * jax.random.normal(ks[0], (H, TOK_DIM), jnp.float32),
        'b_tok': jnp.zeros((TOK_DIM,), jnp.float32),
        'W_cls': 0.02 * jax.random.normal(ks[1], (H, CLS_DIM), jnp.float32),
        'b_cls': jnp.zeros((CLS_DIM,), jnp.float32),
    }

    # synthetic "BERT" outputs for queries and docs
    q_hidden = jax.random.normal(ks[2], (B, L, H), jnp.float32)
    q_logits = jax.random.normal(ks[3], (B, L, V), jnp.float32)
    d_hidden = jax.random.normal(ks[4], (B, L, H), jnp.float32)
    d_logits = jax.random.normal(ks[5], (B, L, V), jnp.float32)
    pos = jnp.arange(L)[None, :]
    q_mask = (pos < jnp.array([8, 6])[:, None]).astype(jnp.float32)
    d_mask = (pos < jnp.array([7, 8])[:, None]).astype(jnp.float32)

    # encode_query -> topk=1 ; encode_doc -> topk=5 ; evaluate_score -> score_cart
    q_emb = citadel_embed(q_hidden, q_logits, q_mask, params, topk=1)
    d_emb = citadel_embed(d_hidden, d_logits, d_mask, params, topk=5)
    scores = citadel_score_cart(q_emb, d_emb)
    jax.block_until_ready(scores)

    # correctness check against plain-JAX references
    q_ref = embed_ref(q_hidden, q_logits, q_mask, params, topk=1)
    d_ref = embed_ref(d_hidden, d_logits, d_mask, params, topk=5)
    np.testing.assert_allclose(q_emb['expert_repr'], q_ref['expert_repr'], rtol=2e-3, atol=2e-3)
    np.testing.assert_allclose(q_emb['router_repr'], q_ref['router_repr'], rtol=2e-3, atol=2e-3)
    np.testing.assert_allclose(q_emb['expert_weights'], q_ref['expert_weights'], rtol=2e-3, atol=2e-3)
    np.testing.assert_allclose(d_emb['expert_repr'], d_ref['expert_repr'], rtol=2e-3, atol=2e-3)
    np.testing.assert_allclose(d_emb['router_repr'], d_ref['router_repr'], rtol=2e-3, atol=2e-3)
    np.testing.assert_allclose(d_emb['cls_repr'], d_ref['cls_repr'], rtol=2e-3, atol=2e-3)
    ref_scores = score_cart_ref(q_emb, d_emb)
    np.testing.assert_allclose(scores, ref_scores, rtol=2e-3, atol=2e-3)

    print("KERNEL_OK")
</pallas_src>

<mosaic_0001>
module attributes {stable_mosaic.version = 11 : i64} {
  func.func @_router_kernel(%arg0: i32, %arg1: i32, %arg2: memref<1x7x64xf32, #tpu.memory_space<vmem>>, %arg3: memref<1x7x1xf32, #tpu.memory_space<vmem>>, %arg4: memref<1x7x64xf32, #tpu.memory_space<vmem>>, %arg5: memref<1x1x64xf32, #tpu.memory_space<vmem>>) attributes {dimension_semantics = [#tpu.dimension_semantics<parallel>, #tpu.dimension_semantics<parallel>], iteration_bounds = array<i64: 2, 1>, scalar_prefetch = 0 : i64, scratch_operands = 0 : i64, tpu.core_type = #tpu.core_type<tc>, window_params = [{transform_indices = @transform_0, window_bounds = array<i64: 1, 7, 64>}, {transform_indices = @transform_1, window_bounds = array<i64: 1, 7, 1>}, {transform_indices = @transform_2, window_bounds = array<i64: 1, 7, 64>}, {transform_indices = @transform_3, window_bounds = array<i64: 1, 1, 64>}]} {
    %c0 = arith.constant 0 : index
    %c0_0 = arith.constant 0 : index
    %c0_1 = arith.constant 0 : index
    %0 = vector.load %arg3[%c0, %c0_0, %c0_1] : memref<1x7x1xf32, #tpu.memory_space<vmem>>, vector<1x7x1xf32>
    %1 = vector.shape_cast %0 : vector<1x7x1xf32> to vector<7x1xf32>
    %c0_2 = arith.constant 0 : index
    %c0_3 = arith.constant 0 : index
    %c0_4 = arith.constant 0 : index
    %2 = vector.load %arg2[%c0_2, %c0_3, %c0_4] : memref<1x7x64xf32, #tpu.memory_space<vmem>>, vector<1x7x64xf32>
    %3 = vector.shape_cast %2 : vector<1x7x64xf32> to vector<7x64xf32>
    %cst = arith.constant 0.000000e+00 : f32
    %4 = vector.broadcast %cst : f32 to vector<7x64xf32>
    %5 = arith.maximumf %3, %4 : vector<7x64xf32>
    %cst_5 = arith.constant 1.000000e+00 : f32
    %6 = vector.broadcast %cst_5 : f32 to vector<7x64xf32>
    %7 = arith.addf %6, %5 : vector<7x64xf32>
    %8 = math.log %7 : vector<7x64xf32>
    %9 = vector.broadcast %1 : vector<7x1xf32> to vector<7x64xf32>
    %10 = arith.mulf %8, %9 : vector<7x64xf32>
    %c0_6 = arith.constant 0 : index
    %c0_7 = arith.constant 0 : index
    %c0_8 = arith.constant 0 : index
    %11 = vector.load %arg4[%c0_6, %c0_7, %c0_8] : memref<1x7x64xf32, #tpu.memory_space<vmem>>, vector<1x7x64xf32>
    %12 = vector.shape_cast %11 : vector<1x7x64xf32> to vector<7x64xf32>
    %13 = vector.shape_cast %10 : vector<7x64xf32> to vector<1x7x64xf32>
    tpu.vector_store %arg4[%c0_6, %c0_7, %c0_8], %13 {strides = array<i32>} : memref<1x7x64xf32, #tpu.memory_space<vmem>>, vector<1x7x64xf32>,
    %cst_9 = arith.constant dense<0xFF800000> : vector<64xf32>
    %14 = vector.multi_reduction <maximumf>, %10, %cst_9 [0] : vector<7x64xf32> to vector<64xf32>
    %15 = vector.shape_cast %14 : vector<64xf32> to vector<1x64xf32>
    %c0_10 = arith.constant 0 : index
    %c0_11 = arith.constant 0 : index
    %c0_12 = arith.constant 0 : index
    %16 = vector.load %arg5[%c0_10, %c0_11, %c0_12] : memref<1x1x64xf32, #tpu.memory_space<vmem>>, vector<1x1x64xf32>
    %17 = vector.shape_cast %16 : vector<1x1x64xf32> to vector<1x64xf32>
    %18 = vector.shape_cast %15 : vector<1x64xf32> to vector<1x1x64xf32>
    tpu.vector_store %arg5[%c0_10, %c0_11, %c0_12], %18 {strides = array<i32>} : memref<1x1x64xf32, #tpu.memory_space<vmem>>, vector<1x1x64xf32>,
    return
  }
  func.func @transform_0(%arg0: i32, %arg1: i32) -> (i32, i32, i32) {
    %c0_i32 = arith.constant 0 : i32
    %c0_i32_0 = arith.constant 0 : i32
    return %arg0, %c0_i32, %arg1 : i32, i32, i32
  }
  func.func @transform_1(%arg0: i32, %arg1: i32) -> (i32, i32, i32) {
    %c0_i32 = arith.constant 0 : i32
    %c0_i32_0 = arith.constant 0 : i32
    %c0_i32_1 = arith.constant 0 : i32
    return %arg0, %c0_i32, %c0_i32_0 : i32, i32, i32
  }
  func.func @transform_2(%arg0: i32, %arg1: i32) -> (i32, i32, i32) {
    %c0_i32 = arith.constant 0 : i32
    %c0_i32_0 = arith.constant 0 : i32
    return %arg0, %c0_i32, %arg1 : i32, i32, i32
  }
  func.func @transform_3(%arg0: i32, %arg1: i32) -> (i32, i32, i32) {
    %c0_i32 = arith.constant 0 : i32
    %c0_i32_0 = arith.constant 0 : i32
    return %arg0, %c0_i32, %arg1 : i32, i32, i32
  }
}

</mosaic_0001>

<bundles_post_ra>
// kernel: tpu_custom_call.1
= control target key start
LH: loop header
LB: loop body
LE: loop exit
PB: predicated region body
PF: predicated region fallthrough
CT: control target
= control target key end

     0   :  { %9 = vsyncpa [#allocation3], 0  ;;  %s658_s0 = inlined_call_operand.vmem [shape: f32[2,7,64], index: 0, kind: input, shape index: {}]   ;;  %s659_s1 = inlined_call_operand.vmem [shape: f32[2,7,1], index: 1, kind: input, shape index: {}]   ;;  %s660_s2 = inlined_call_operand.vmem [shape: f32[2,7,64], index: 2, kind: output, shape index: {0}]   ;;  %s661_s3 = inlined_call_operand.hbm [shape: f32[2,1,64], index: 3, kind: output, shape index: {1}]  }
   0x1   :  { %11 = vsyncpa [#allocation3 + $0x1], 0  ;;  %s553_s12 = smov 0   ;;  %s555_s13 = smov 0  }
   0x2   :  { %s557_s14 = smov 0   ;;  %s559_s15 = smov 0  }
   0x3   :  { %s561_s16 = smov 0   ;;  %s563_s17 = smov 0  }
   0x4 LB: > { %s383_s18 = sadd.s32 4294967295, %s529_s17   ;;  %s384_s19 = sadd.s32 4294967294, %s529_s17   ;;  %s529_s17 = sphi %s563_s17, %s17_s17   ;;  %s525_s16 = sphi %s561_s16, %s668_s16   ;;  %s521_s15 = sphi %s559_s15, %s667_s15   ;;  %s517_s14 = sphi %s557_s14, %s666_s14   ;;  %s513_s13 = sphi %s555_s13, %s665_s13   ;;  %s509_s12 = sphi %s553_s12, %s664_s12  }
   0x5   : > { %s29_s20 = sadd.s32 1, %s525_s16  ;;  %s120_s21 = sadd.s32 1, %s517_s14 }
   0x6   : > { %p31_p0 = scmp.ge.s32.totalorder %s29_s20, 2  ;;  %p130_p1 = scmp.ne.s32.totalorder %s517_s14, %s513_s13 }
   0x7   : > { %p131_p2 = scmp.eq.s32.totalorder %s383_s18, 1  ;;  %p136_p3 = scmp.ne.s32.totalorder %s513_s13, %s509_s12 }
   0x8   : > { %s670_s20 = smov (%p31_p0, %s29_s20), 0  ;;  %p137_p5 = scmp.eq.s32.totalorder %s384_s19, 1 }
   0x9   : > { %p593_p4 = por %p131_p2, %p130_p1  ;;  %s115_s23 = ssub.s32 %s525_s16, %s670_s20 }
   0xa   : > { %p387_p6 = scmp.ge.s32.totalorder %s529_s17, 1  ;;  %p118_p7 = scmp.eq.s32.totalorder %s115_s23, 0 }
   0xb   : > { %p600_p8 = por %p137_p5, %p136_p3  ;;  %p172_p9 = scmp.lt.s32.totalorder %s529_s17, 3 }
   0xc   : > { %s606_s25 = scalar_select %p118_p7, %s517_s14, %s120_s21  }
   0xd   : > { %p173_p10 = pnand %p387_p6, %p172_p9 }
   0xe   : > { %p208_p11 = scmp.lt.s32.totalorder (!%p173_p10), %s521_s15, 1  ;;  %s206_s10 = sand.u32 (!%p173_p10), 1, %s513_s13  }
   0xf   : > { %176 = sbr.rel (%p173_p10) target bundleno = 177 (0xb1), region = 28  ;;  %s391_s11 = sshll.u32 (!%p173_p10), %s521_s15, 4 }
  0x10   : > { %s207_s18 = scalar_lea.vmem (!%p173_p10), [#allocation2], %s206_s10  ;;  %s532_s29 = smov (!%p173_p10), [#allocation2]  }
  0x11   : > { %s273_s19 = sshll.u32 (!%p173_p10), %s207_s18, 4  ;;  %s274_s19 = int_to_ptr.vmem [resolvable:$true] %s273_s19 }
  0x12   : > { %s453_s28 = scalar_lea.vmem (!%p173_p10), %s274_s19, 16 }
  0x13   : > { %p454_p12 = scmp.ne.s32.totalorder (!%p173_p10), %s274_s19, %s453_s28 }
  0x14   : > { %v531_v0 = vmov 0   ;;  %s209_s26 = scalar_select %p208_p11, %s521_s15, 1  ;;  %vm238_vm0 = vcmask 522240   ;;  %vm247_vm1 = vcmask 516096  }
  0x15   : > { %450 = vset.pattern.permute.xlu0 %v531_v0  ;;  %p455_p13 = pnand %p454_p12, %p593_p4 }
  0x16   : > { %s388_s27 = sshll.u32 %s209_s26, 3  ;;  %s271_s26 = scalar_lea.hbm %s661_s3, %s391_s11 }
  0x17   : > { %s218_s30 = scalar_lea.vmem %s659_s1, %s388_s27  ;;  %s214_s6 = scalar_lea.vmem %s658_s0, %s388_s27 }
  0x18   : > { %v226_v1 = vld [vmem:[%s218_s30] sm:$0x7f]  ;;  %s225_s9 = scalar_lea.vmem %s660_s2, %s388_s27  ;;  %s257_s27 = scalar_lea.sflag [#allocation3], %s206_s10 }
  0x19   : > { %234 = vperm.xlu0 %450, %v226_v1   ;;  %v227_v2 = vld [vmem:[%s214_s6] sm:$0x7f]  ;;  %p456_p0 = pneg %p455_p13  ;;  %s457_s30 = sshll.u32 %s532_s29, 4  ;;  %s458_s30 = int_to_ptr.vmem [resolvable:$false] %s457_s30 }
  0x1a   : > { %v228_v3 = vmax.f32 %v227_v2, 0.0  ;;  %s459_s15 = scalar_lea.vmem %s458_s30, 32  ;;  %p460_p1 = scmp.lt.s32.totalorder %s274_s19, %s458_s30 }
  0x1b   : > { %p461_p2 = scmp.lt.s32.totalorder %s459_s15, %s453_s28 }
  0x1c   : > { %v229_v4 = vadd.f32 1.0, %v228_v3 }
  0x1d   : > { %p462_p3 = por %p461_p2, %p460_p1 }
  0x1e   : > { %451 = vlog2.f32 %v229_v4 }
  0x1f   : > { %p463_p5 = pnand %p462_p3, %p456_p0 }
  0x2b   : > { %v452_v5 = vpop.eup %451 }
  0x2c   : > { %v231_v6 = vmul.f32 0.6931472, %v452_v5 }
  0x94   : > { %v235_v7 = vpop.permute.xlu0 %234 }
  0x95   : > { %v237_v8 = vmul.f32 %v235_v7, %v231_v6 }
  0x97   : > { %239 = vst.msk [vmem:[%s225_s9] sm:$0x7f] %vm238_vm0, %v237_v8  ;;  %v240_v9 = vsel %vm238_vm0, %v237_v8, -inf }
  0x98   : > { %v241_v10 = vrot.slane %v240_v9, 4 }
  0x9a   : > { %v242_v11 = vmax.f32 %v240_v9, %v241_v10 }
  0x9c   : > { %v243_v12 = vrot.slane %v242_v11, 2 }
  0x9e   : > { %v244_v13 = vmax.f32 %v242_v11, %v243_v12 }
  0xa0   : > { %v245_v14 = vrot.slane %v244_v13, 1 }
  0xa2   : > { %v246_v15 = vmax.f32 %v244_v13, %v245_v14 }
  0xa4   : > { %248 = vst.msk [vmem:[%s207_s18] sm:$0x1] %vm247_vm1, %v246_v15 }
  0xa5   : > { %466 = shalt.err (!%p463_p5)
}
  0xa6   : > { %s467_s4 = scalar_lea.hbm %s271_s26, 16  ;;  %s471_s7 = scalar_lea.hbm %s661_s3, 32 }
  0xa7   : > { %p468_p6 = scmp.ne.s32.totalorder %s271_s26, %s467_s4  ;;  %p472_p10 = scmp.lt.s32.totalorder %s271_s26, %s661_s3 }
  0xa8   : > { %p473_p11 = scmp.lt.s32.totalorder %s471_s7, %s467_s4 }
  0xa9   : > { %p469_p7 = pnand %p468_p6, %p593_p4 }
  0xaa   : > { %p474_p12 = por %p473_p11, %p472_p10 }
  0xab   : > { %p470_p9 = pneg %p469_p7 }
  0xad   : > { %p475_p13 = pnand %p474_p12, %p470_p9 }
  0xaf   : > { %478 = shalt.err (!%p475_p13)
}
  0xb0   : > { %394 = dma.vmem_to_hbm [thread:$0]  (%p593_p4), %s274_s19, 16, %s271_s26, %s257_s27  }
  0xb1 PF: > { %p400_p0 = scmp.ge.s32.totalorder %s529_s17, 2  ;;  %s295_s10 = sand.u32 1, %s509_s12  }
  0xb2   : > { %s296_s11 = scalar_lea.sflag [#allocation3], %s295_s10 }
  0xb3   : > { %p397_p1 = pnand %p400_p0, %p600_p8 }
  0xb5   : > { %p398_p2 = pneg %p397_p1 }
  0xb7   : > { %504 = dma.done.wait (%p398_p2), %s296_s11, 16  }
  0xb8   : > { %506 = vsyncadd (%p398_p2), %s296_s11, 4294967280  ;;  %s17_s17 = sadd.s32 1, %s529_s17   ;;  %s664_s12 = smov %s513_s13 }
  0xb9   : > { %p14_p3 = scmp.ge.s32.totalorder %s17_s17, 4   ;;  %s665_s13 = smov %s517_s14 }
  0xba   : > { %s666_s14 = smov %s606_s25  ;;  %s667_s15 = smov %s525_s16 }
  0xbb   : > { %s668_s16 = smov %s670_s20  ;;  %16 = sbr.rel (!%p14_p3) target bundleno = 4 (0x4), region = 78 }
  0xc0   :  { %300 = vsyncpa [#allocation3], 1 }
  0xc1   :  { %302 = vsyncpa [#allocation3 + $0x1], 1 }

</bundles_post_ra>
